<compile_context>
chip_gen: v5e
topology: v5e:2x2
jax: 0.10.0
libtpu: 0.0.40
codegen_flags: <defaults>
</compile_context>

<pallas_src>
import math

import jax
import jax.numpy as jnp
from jax.experimental import pallas as pl
from jax.experimental.pallas import tpu as pltpu


# --------------------------------------------------------------------------
# torch.split section semantics
# --------------------------------------------------------------------------
def _resolve_sections(total: int, split_size_or_sections) -> list[int]:
    if isinstance(split_size_or_sections, int):
        s = split_size_or_sections
        sizes, rem = [], total
        while rem > 0:
            sizes.append(min(s, rem))
            rem -= s
        return sizes
    sizes = list(split_size_or_sections)
    assert sum(sizes) == total, "sections must sum to the split-dim size"
    return sizes


# --------------------------------------------------------------------------
# generation-aware budgets
# --------------------------------------------------------------------------
def _generation_budgets():
    """Return (input-tile budget bytes, scoped-vmem cap bytes, two_core_chip)."""
    vmem_bytes = None
    try:
        info = pltpu.get_tpu_info()
        vmem_bytes = getattr(info, "vmem_capacity_bytes", None)
    except Exception:
        vmem_bytes = None
    if vmem_bytes is None:
        vmem_bytes = 64 * 1024 * 1024          # conservative: assume v7x-like
    if vmem_bytes >= 96 * 1024 * 1024:
        # v5e / v6e: 128 MiB VMEM per TensorCore -> bigger tiles, generous limit.
        return 12 * 1024 * 1024, 100 * 1024 * 1024, False
    # v7x: 64 MiB VMEM (leave headroom for Mosaic scratch), 2 TCs per chip.
    return 5 * 1024 * 1024, 52 * 1024 * 1024, True


def _vmem_limit(step_bytes: int, cap: int) -> int:
    # step_bytes = live tile bytes of one grid step; Pallas double-buffers.
    return int(min(cap, max(32 * 1024 * 1024, 2 * step_bytes + (4 << 20))))


def _sublane_multiple(itemsize: int) -> int:
    # f32 -> 8, bf16 -> 16, int8/fp8 -> 32 (packed sublane tiles).
    return max(8, 32 // max(1, itemsize))


def _pick_rows(pre: int, row_bytes: int, budget: int, align: int) -> int:
    """Row tile near the budget; ragged last block is handled by pl.cdiv grid."""
    max_tr = max(1, budget // max(1, row_bytes))
    if pre <= max_tr:
        return pre
    tr = (max_tr // align) * align
    if tr <= 0:
        tr = min(pre, align)
    return tr


def _bump_even_steps(pre: int, tr: int, align: int, other_steps: int = 1) -> int:
    """On 2-TC chips avoid an odd parallel step count (one idle tail step)."""
    steps = pl.cdiv(pre, tr)
    if steps <= 1 or (steps * other_steps) % 2 == 0:
        return tr
    new_tr = -(-pre // (steps + 1))
    if align > 1:
        new_tr = -(-new_tr // align) * align
    new_tr = max(1, min(new_tr, tr))
    if (pl.cdiv(pre, new_tr) * other_steps) % 2 == 0:
        return new_tr
    return tr


# --------------------------------------------------------------------------
# Kernels — pure tile copies (zero FLOPs, HBM-bandwidth bound)
# --------------------------------------------------------------------------
def _lane_split_kernel(widths):
    # x tile (tr, W), W = sum(widths); outputs are contiguous lane slabs.
    offsets, off = [], 0
    for w in widths:
        offsets.append(off)
        off += w

    def kernel(x_ref, *out_refs):
        for o_ref, w, o in zip(out_refs, widths, offsets):
            o_ref[...] = x_ref[:, o:o + w]
    return kernel


def _sublane_split_kernel(sizes):
    # x tile (tr, D, tp); outputs are slabs along the middle (sublane-ish) dim.
    offsets, off = [], 0
    for s in sizes:
        offsets.append(off)
        off += s

    def kernel(x_ref, *out_refs):
        for o_ref, s, o in zip(out_refs, sizes, offsets):
            o_ref[...] = x_ref[:, o:o + s, :]
    return kernel


# --------------------------------------------------------------------------
# Wrapper
# --------------------------------------------------------------------------
def fork_split(x: jax.Array, split_size_or_sections, dim: int = 1,
               *, _tile_budget_bytes: int | None = None):
    """Pallas equivalent of torch.split(x, split_size_or_sections, dim)."""
    ndim = x.ndim
    dim = dim % ndim
    D = x.shape[dim]
    sizes = _resolve_sections(D, split_size_or_sections)
    offs, o = [], 0
    for s in sizes:
        offs.append(o)
        o += s

    pre = int(math.prod(x.shape[:dim]))
    post = int(math.prod(x.shape[dim + 1:]))
    itemsize = jnp.dtype(x.dtype).itemsize

    tile_budget, vmem_cap, two_core = _generation_budgets()
    if _tile_budget_bytes is not None:            # testing hook
        tile_budget = int(_tile_budget_bytes)
    sub_mult = _sublane_multiple(itemsize)

    out_full_shapes = []
    for s in sizes:
        shp = list(x.shape)
        shp[dim] = s
        out_full_shapes.append(tuple(shp))

    W = D * post
    lane_aligned = all((off * post) % 128 == 0 for off in offs)
    row_fits = W * itemsize <= 2 * tile_budget

    # ------------- Path A: lane-dense (pre, D*post) view, static lane slices.
    # Single contiguous input DMA per step; slab selection is pure vreg selects
    # when offsets are 128-aligned (also the only option when post == 1).
    if post == 1 or (lane_aligned and row_fits):
        x2 = x.reshape(pre, W)
        widths = [s * post for s in sizes]
        tr = _pick_rows(pre, W * itemsize, tile_budget, sub_mult)
        if two_core:
            tr = _bump_even_steps(pre, tr, sub_mult)
        grid = (pl.cdiv(pre, tr),)
        in_specs = [pl.BlockSpec((tr, W), lambda r: (r, 0))]
        out_specs = tuple(pl.BlockSpec((tr, w), lambda r: (r, 0)) for w in widths)
        out_shapes = tuple(jax.ShapeDtypeStruct((pre, w), x.dtype) for w in widths)
        step_bytes = 2 * tr * W * itemsize
        outs = pl.pallas_call(
            _lane_split_kernel(widths),
            grid=grid,
            in_specs=in_specs,
            out_specs=out_specs,
            out_shape=out_shapes,
            compiler_params=pltpu.CompilerParams(
                dimension_semantics=("parallel",),
                vmem_limit_bytes=_vmem_limit(step_bytes, vmem_cap)),
        )(x2)
        return tuple(o_.reshape(shp) for o_, shp in zip(outs, out_full_shapes))

    # ------------- Path B: (pre, D, post) view, split along the middle dim.
    # Used when sections are not 128-lane aligned (or a single row is huge);
    # the split lands on the sublane axis so no lane rotation is needed.
    x3 = x.reshape(pre, D, post)
    if post <= 128:
        tp = post                                   # full lane dim
    else:
        cap_lanes = max(128, tile_budget // max(1, D * itemsize))
        tp = post if cap_lanes >= post else max(128, (cap_lanes // 128) * 128)
    row_bytes = D * tp * itemsize
    tr = _pick_rows(pre, row_bytes, tile_budget, 1)  # leading dim: no (8,128) rule
    steps_p = pl.cdiv(post, tp)
    if two_core:
        tr = _bump_even_steps(pre, tr, 1, other_steps=steps_p)
    grid = (pl.cdiv(pre, tr), steps_p)
    in_specs = [pl.BlockSpec((tr, D, tp), lambda r, p: (r, 0, p))]
    out_specs = tuple(
        pl.BlockSpec((tr, s, tp), lambda r, p: (r, 0, p)) for s in sizes)
    out_shapes = tuple(
        jax.ShapeDtypeStruct((pre, s, post), x.dtype) for s in sizes)
    step_bytes = 2 * tr * D * tp * itemsize
    outs = pl.pallas_call(
        _sublane_split_kernel(sizes),
        grid=grid,
        in_specs=in_specs,
        out_specs=out_specs,
        out_shape=out_shapes,
        compiler_params=pltpu.CompilerParams(
            dimension_semantics=("parallel", "parallel"),
            vmem_limit_bytes=_vmem_limit(step_bytes, vmem_cap)),
    )(x3)
    return tuple(o_.reshape(shp) for o_, shp in zip(outs, out_full_shapes))


# --------------------------------------------------------------------------
# Smoke test
# --------------------------------------------------------------------------
if __name__ == "__main__":
    key = jax.random.PRNGKey(0)
    k0, k1, k2 = jax.random.split(key, 3)

    # NCHW input, split along the channel dim (dim=1).
    x = jax.random.normal(k0, (2, 4, 16, 16), dtype=jnp.float32)

    # 1) int split_size -> equal sections (Path A: lane-aligned slabs)
    outs = jax.block_until_ready(fork_split(x, 2, dim=1))
    refs = jnp.split(x, 2, axis=1)
    assert len(outs) == len(refs)
    for o_, r_ in zip(outs, refs):
        assert o_.shape == r_.shape and o_.dtype == r_.dtype
        assert jnp.array_equal(o_, r_)

    # 2) uneven sections like torch.split(x, [1, 3], dim=1)
    #    (128-lane-aligned offsets -> now stays on Path A)
    outs2 = jax.block_until_ready(fork_split(x, [1, 3], dim=1))
    assert outs2[0].shape == (2, 1, 16, 16) and outs2[1].shape == (2, 3, 16, 16)
    assert jnp.array_equal(outs2[0], x[:, :1])
    assert jnp.array_equal(outs2[1], x[:, 1:])

    # 3) split along the last dim (post == 1 lane-slice path)
    outs3 = jax.block_until_ready(fork_split(x, 8, dim=-1))
    assert outs3[0].shape == (2, 4, 16, 8) and outs3[1].shape == (2, 4, 16, 8)
    assert jnp.array_equal(outs3[0], x[..., :8])
    assert jnp.array_equal(outs3[1], x[..., 8:])

    # 4) non-128-aligned lane offsets -> Path B (sublane-axis slab copy)
    xb = jax.random.normal(k1, (2, 4, 8, 8), dtype=jnp.float32)
    outs4 = jax.block_until_ready(fork_split(xb, [1, 3], dim=1))
    assert outs4[0].shape == (2, 1, 8, 8) and outs4[1].shape == (2, 3, 8, 8)
    assert jnp.array_equal(outs4[0], xb[:, :1])
    assert jnp.array_equal(outs4[1], xb[:, 1:])

    # 5) ragged pipelined grid (tiny tile budget forces multi-step + partial
    #    edge block: pre=20, tr=8 -> 3 steps, last one ragged)
    xr = jax.random.normal(k2, (20, 4, 16, 16), dtype=jnp.float32)
    outs5 = jax.block_until_ready(fork_split(xr, 2, dim=1, _tile_budget_bytes=32768))
    refs5 = jnp.split(xr, 2, axis=1)
    for o_, r_ in zip(outs5, refs5):
        assert o_.shape == r_.shape and jnp.array_equal(o_, r_)

    print("KERNEL_OK")
</pallas_src>

<mosaic_0001>
module attributes {stable_mosaic.version = 11 : i64} {
  func.func @kernel(%arg0: i32, %arg1: memref<2x1024xf32, #tpu.memory_space<vmem>>, %arg2: memref<2x512xf32, #tpu.memory_space<vmem>>, %arg3: memref<2x512xf32, #tpu.memory_space<vmem>>) attributes {dimension_semantics = [#tpu.dimension_semantics<parallel>], iteration_bounds = array<i64: 1>, scalar_prefetch = 0 : i64, scratch_operands = 0 : i64, tpu.core_type = #tpu.core_type<tc>, window_params = [{transform_indices = @transform_0, window_bounds = array<i64: 2, 1024>}, {transform_indices = @transform_1, window_bounds = array<i64: 2, 512>}, {transform_indices = @transform_2, window_bounds = array<i64: 2, 512>}]} {
    %c0 = arith.constant 0 : index
    %c0_0 = arith.constant 0 : index
    %0 = vector.load %arg1[%c0, %c0_0] : memref<2x1024xf32, #tpu.memory_space<vmem>>, vector<2x512xf32>
    %c0_1 = arith.constant 0 : index
    %c0_2 = arith.constant 0 : index
    %1 = vector.load %arg2[%c0_1, %c0_2] : memref<2x512xf32, #tpu.memory_space<vmem>>, vector<2x512xf32>
    tpu.vector_store %arg2[%c0_1, %c0_2], %0 {strides = array<i32>} : memref<2x512xf32, #tpu.memory_space<vmem>>, vector<2x512xf32>,
    %c0_3 = arith.constant 0 : index
    %c512 = arith.constant 512 : index
    %2 = vector.load %arg1[%c0_3, %c512] : memref<2x1024xf32, #tpu.memory_space<vmem>>, vector<2x512xf32>
    %c0_4 = arith.constant 0 : index
    %c0_5 = arith.constant 0 : index
    %3 = vector.load %arg3[%c0_4, %c0_5] : memref<2x512xf32, #tpu.memory_space<vmem>>, vector<2x512xf32>
    tpu.vector_store %arg3[%c0_4, %c0_5], %2 {strides = array<i32>} : memref<2x512xf32, #tpu.memory_space<vmem>>, vector<2x512xf32>,
    return
  }
  func.func @transform_0(%arg0: i32) -> (i32, i32) {
    %c0_i32 = arith.constant 0 : i32
    %c0_i32_0 = arith.constant 0 : i32
    return %arg0, %c0_i32 : i32, i32
  }
  func.func @transform_1(%arg0: i32) -> (i32, i32) {
    %c0_i32 = arith.constant 0 : i32
    %c0_i32_0 = arith.constant 0 : i32
    return %arg0, %c0_i32 : i32, i32
  }
  func.func @transform_2(%arg0: i32) -> (i32, i32) {
    %c0_i32 = arith.constant 0 : i32
    %c0_i32_0 = arith.constant 0 : i32
    return %arg0, %c0_i32 : i32, i32
  }
}

</mosaic_0001>

<bundles_post_ra>
// kernel: tpu_custom_call.1
= control target key start
LH: loop header
LB: loop body
LE: loop exit
PB: predicated region body
PF: predicated region fallthrough
CT: control target
= control target key end

     0   :  { %8 = vsyncpa [#allocation3], 0  ;;  %s171_s0 = inlined_call_operand.hbm [shape: f32[2,1024], index: 0, kind: input, shape index: {}]   ;;  %s172_s1 = inlined_call_operand.hbm [shape: f32[2,512], index: 1, kind: output, shape index: {0}]   ;;  %s173_s2 = inlined_call_operand.hbm [shape: f32[2,512], index: 2, kind: output, shape index: {1}]  }
   0x1   :  { %9 = vsyncpa [#allocation4], 0 }
   0x2   :  { %10 = vsyncpa [#allocation7], 0  ;;  %s16_s11 = sshll.u32 %s171_s0, 4  ;;  %s144_s12 = smov [#allocation2]   ;;  %s17_s11 = int_to_ptr.hbm [resolvable:$true] %s16_s11 }
   0x3   :  { %s18_s13 = sshll.u32 %s144_s12, 4  ;;  %s19_s13 = int_to_ptr.vmem [resolvable:$true] %s18_s13 }
   0x4   :  { %21 = dma.hbm_to_vmem [thread:$0]  %s17_s11, 256, %s19_s13, [#allocation3]  }
   0x5   :  { %138 = dma.done.wait [#allocation3], 256  }
   0x6   :  { %139 = vsyncadd [#allocation3], 4294967040  ;;  %s145_s14 = smov [#allocation5]   ;;  %s37_s18 = sshll.u32 %s172_s1, 4  ;;  %v26_v0 = vld [vmem:[#allocation2] sm:$0xff]  ;;  %v28_v1 = vld [vmem:[#allocation2 + $0x8] sm:$0xff]  ;;  %s38_s18 = int_to_ptr.hbm [resolvable:$true] %s37_s18 }
   0x7   :  { %s35_s15 = sshll.u32 %s145_s14, 4  ;;  %s146_s19 = smov [#allocation6]   ;;  %27 = vst [vmem:[#allocation5] sm:$0xff] %v26_v0  ;;  %s36_s15 = int_to_ptr.vmem [resolvable:$true] %s35_s15 }
   0x8   :  { %s46_s20 = sshll.u32 %s146_s19, 4  ;;  %s48_s23 = sshll.u32 %s173_s2, 4  ;;  %29 = vst [vmem:[#allocation6] sm:$0xff] %v28_v1  ;;  %s47_s20 = int_to_ptr.vmem [resolvable:$true] %s46_s20  ;;  %s49_s23 = int_to_ptr.hbm [resolvable:$true] %s48_s23 }
   0x9   :  { %40 = dma.vmem_to_hbm [thread:$0]  %s36_s15, 128, %s38_s18, [#allocation4]  }
   0xa   :  { %51 = dma.vmem_to_hbm [thread:$0]  %s47_s20, 128, %s49_s23, [#allocation7]  }
   0xb   :  { %140 = dma.done.wait [#allocation4], 128  }
   0xc   :  { %141 = vsyncadd [#allocation4], 4294967168 }
   0xd   :  { %142 = dma.done.wait [#allocation7], 128  }
   0xe   :  { %143 = vsyncadd [#allocation7], 4294967168 }
   0xf   :  { %60 = vsyncpa [#allocation3], 1 }
  0x10   :  { %61 = vsyncpa [#allocation4], 1 }
  0x11   :  { %62 = vsyncpa [#allocation7], 1 }

</bundles_post_ra>
